<compile_context>
chip_gen: v5e
topology: v5e:2x2
jax: 0.10.0
libtpu: 0.0.40
codegen_flags: <defaults>
</compile_context>

<pallas_src>
import functools

import jax
import jax.numpy as jnp
from jax import lax
from jax.experimental import pallas as pl
from jax.experimental.pallas import tpu as pltpu

PAD = 0          # padding token id (matches the repo's convention)
NEG_BIAS = -1e30  # bias used for padded vocab columns


def _round_up(x, m):
    return ((x + m - 1) // m) * m


def classifier_kernel(v_real, needs_rs_mask,
                      x_ref, w_ref, b_ref, gold_ref, mask_ref,
                      out_ref, m_sc, s_sc, gl_sc, rs_sc):
    """grid = (row tiles [parallel], vocab tiles [arbitrary]).

    Scratch (all (tn, 1) f32) carries online-softmax state across vocab tiles:
      m_sc: running max, s_sc: rescaled sum-exp, gl_sc: gold logit,
      rs_sc: row-sum of logits (for the smoothing term).
    At the last vocab tile the per-row-tile stats are written into an
    (8, 128) output block: row0=nll, row1=smooth, row2=abs_logZ, row3=ok.
    """
    j = pl.program_id(1)
    nj = pl.num_programs(1)

    tn = x_ref.shape[0]
    tv = w_ref.shape[0]

    @pl.when(j == 0)
    def _init():
        m_sc[...] = jnp.full_like(m_sc, -jnp.inf)
        s_sc[...] = jnp.zeros_like(s_sc)
        gl_sc[...] = jnp.zeros_like(gl_sc)
        rs_sc[...] = jnp.zeros_like(rs_sc)

    # logits tile (tn, tv): bf16 (tn,H) contracted with bf16 W (tv,H) on H,
    # f32 accumulation on the MXU; bias added in f32.  Padded vocab columns
    # (zero weight rows + NEG_BIAS bias) come out as exactly -1e30.
    logits = lax.dot_general(
        x_ref[...], w_ref[...],
        dimension_numbers=(((1,), (1,)), ((), ())),
        preferred_element_type=jnp.float32) + b_ref[...].astype(jnp.float32)

    gold = gold_ref[...]                                          # (tn, 1) int32
    col = j * tv + lax.broadcasted_iota(jnp.int32, (tn, tv), 1)   # global vocab id

    # --- online log-sum-exp across vocab tiles (padded cols contribute 0) ---
    m_t = jnp.max(logits, axis=-1, keepdims=True)                 # (tn, 1)
    m_prev = m_sc[...]
    m_new = jnp.maximum(m_prev, m_t)
    s_sc[...] = s_sc[...] * jnp.exp(m_prev - m_new) + \
        jnp.sum(jnp.exp(logits - m_new), axis=-1, keepdims=True)
    m_sc[...] = m_new

    # --- gold-logit gather (single fused select) ---
    gl_sc[...] += jnp.sum(jnp.where(col == gold, logits, 0.0),
                          axis=-1, keepdims=True)

    # --- row-sum of logits for the smoothing term ---
    if needs_rs_mask:
        # Only compiled in when the vocab was padded; padded logits are exactly
        # -1e30 so a threshold compare is sufficient.
        rs_val = jnp.where(logits > -1e29, logits, 0.0)
    else:
        rs_val = logits
    rs_sc[...] += jnp.sum(rs_val, axis=-1, keepdims=True)

    @pl.when(j == nj - 1)
    def _finalize():
        mask = mask_ref[...]                                      # (tn, 1) f32
        logZ = jnp.log(s_sc[...]) + m_sc[...]                     # (tn, 1)
        non_pad = (gold != PAD).astype(jnp.float32)
        row_m = mask * non_pad

        # smoothingXentLoss pieces (scalar mixing done outside the kernel)
        nll_p = jnp.sum((logZ - gl_sc[...]) * row_m)
        smooth_p = jnp.sum((float(v_real) * logZ - rs_sc[...]) * row_m)
        absz_p = jnp.sum(jnp.abs(logZ) * mask)                    # (ln*mask).abs().sum()
        # gold is the argmax iff its logit equals the global max
        ok_p = jnp.sum(jnp.where((gl_sc[...] == m_sc[...]) & (gold != PAD),
                                 1.0, 0.0))

        r = lax.broadcasted_iota(jnp.int32, (8, 128), 0)
        tile = jnp.where(r == 0, nll_p,
               jnp.where(r == 1, smooth_p,
               jnp.where(r == 2, absz_p,
               jnp.where(r == 3, ok_p, 0.0))))
        out_ref[0] = tile


@functools.partial(jax.jit,
                   static_argnames=("label_smoothing", "tile_n", "tile_v"))
def classifier_forward(feed_BLO, gold_BL, gold_mask_BL, weight_VH, bias_V,
                       label_smoothing=0.1, tile_n=1024, tile_v=1024):
    """Returns (loss, ce_loss, emb_loss, bow_loss, ok_ytoks, abs_logZ) like the
    PyTorch Classifier.forward (emb_loss / bow_loss disabled -> None).

    Tuning notes: tile_n ~ 768-1024 makes v6e compute-bound on weight streaming;
    v7x is compute-bound already at tile_n ~ 384-512 (use smaller tiles there if
    VMEM is tight); v5e is near compute-bound at tile_n >= 256.
    """
    B, L, H = feed_BLO.shape
    V = weight_VH.shape[0]
    N = B * L

    # --- row tiling; pad with PAD rows (they contribute zero to every stat) ---
    tn = min(tile_n, _round_up(N, 8))
    n_pad = _round_up(N, tn)
    x = feed_BLO.reshape(N, H)
    gold = gold_BL.reshape(N, 1).astype(jnp.int32)
    mask = gold_mask_BL.reshape(N, 1).astype(jnp.float32)
    if n_pad != N:
        x = jnp.pad(x, ((0, n_pad - N), (0, 0)))
        gold = jnp.pad(gold, ((0, n_pad - N), (0, 0)), constant_values=PAD)
        mask = jnp.pad(mask, ((0, n_pad - N), (0, 0)))

    # bf16 MXU inputs, f32 accumulation.  Keep the classifier weight stored in
    # bf16 so this cast (and its full V*H HBM round-trip) disappears.
    x = x.astype(jnp.bfloat16)
    w = weight_VH if weight_VH.dtype == jnp.bfloat16 else weight_VH.astype(jnp.bfloat16)
    b = bias_V.astype(jnp.float32)

    # --- vocab tiling; pad V once so no per-tile overhang masking is needed ---
    if V <= tile_v:
        tv = V
        v_pad = V
    else:
        assert tile_v % 128 == 0, "tile_v must be a multiple of 128"
        tv = tile_v
        v_pad = _round_up(V, tv)
    needs_rs_mask = (v_pad != V)
    if needs_rs_mask:
        w = jnp.pad(w, ((0, v_pad - V), (0, 0)))                  # zero weight rows
        b = jnp.pad(b, (0, v_pad - V), constant_values=NEG_BIAS)  # -1e30 bias
    b = b.reshape(1, v_pad)

    num_i = n_pad // tn
    num_v = v_pad // tv
    grid = (num_i, num_v)

    # vmem_limit from the actual tile footprint (+headroom), capped well below
    # v7x's 64 MiB physical VMEM.
    footprint = (2 * tn * H * 2          # x double buffer (bf16)
                 + 2 * tv * H * 2        # weight double buffer (bf16)
                 + 2 * tv * 4            # bias double buffer
                 + 2 * tn * tv * 4       # logits tile + elementwise temporaries
                 + 4 * tn * 128 * 4      # (tn,1) f32 scratch (lane-padded)
                 + 2 * 8 * 128 * 4)      # output block double buffer
    vmem_limit = int(min(max(int(footprint * 1.5) + (4 << 20), 16 << 20), 56 << 20))

    kernel = functools.partial(classifier_kernel, V, needs_rs_mask)

    stats = pl.pallas_call(
        kernel,
        out_shape=jax.ShapeDtypeStruct((num_i, 8, 128), jnp.float32),
        grid=grid,
        in_specs=[
            pl.BlockSpec((tn, H), lambda i, j: (i, 0)),   # activations (resident over j)
            pl.BlockSpec((tv, H), lambda i, j: (j, 0)),   # weight tile, streamed over V
            # TODO(synk): consider pipeline_mode=pl.Buffered(3) on the weight spec if
            # xprof shows DMA stalls at j==0 (both x and W tiles change on that step).
            pl.BlockSpec((1, tv), lambda i, j: (0, j)),   # bias tile
            pl.BlockSpec((tn, 1), lambda i, j: (i, 0)),   # gold ids
            pl.BlockSpec((tn, 1), lambda i, j: (i, 0)),   # gold mask
        ],
        out_specs=pl.BlockSpec((1, 8, 128), lambda i, j: (i, 0, 0)),
        scratch_shapes=[
            pltpu.VMEM((tn, 1), jnp.float32),   # running max
            pltpu.VMEM((tn, 1), jnp.float32),   # running sum-exp
            pltpu.VMEM((tn, 1), jnp.float32),   # gold logit
            pltpu.VMEM((tn, 1), jnp.float32),   # row-sum of logits
        ],
        compiler_params=pltpu.CompilerParams(
            dimension_semantics=("parallel", "arbitrary"),
            vmem_limit_bytes=vmem_limit),
    )(x, w, b, gold, mask)

    # Tiny wrapper-side reduction over per-row-tile partials.
    nll_loss = jnp.sum(stats[:, 0, 0])
    smooth_loss = jnp.sum(stats[:, 1, 0])
    abs_logZ = jnp.sum(stats[:, 2, 0])
    ok_ytoks = jnp.sum(stats[:, 3, 0].astype(jnp.int32))   # per-tile counts are exact in f32

    eps_i = label_smoothing / V
    loss = (1.0 - label_smoothing) * nll_loss + eps_i * smooth_loss
    ce_loss = nll_loss
    return loss, ce_loss, None, None, ok_ytoks, abs_logZ


def reference_forward(feed_BLO, gold_BL, gold_mask_BL, weight_VH, bias_V,
                      label_smoothing=0.1):
    """Pure-jnp reference mirroring the PyTorch forward (same bf16 matmul inputs
    / f32 accumulation as the kernel so numerics are comparable)."""
    B, L, H = feed_BLO.shape
    V = weight_VH.shape[0]
    x = feed_BLO.reshape(-1, H).astype(jnp.bfloat16)
    w = weight_VH.astype(jnp.bfloat16)
    logits = lax.dot_general(x, w, (((1,), (1,)), ((), ())),
                             preferred_element_type=jnp.float32)
    logits = logits + bias_V[None, :].astype(jnp.float32)          # (N, V)
    m = logits.max(axis=-1, keepdims=True)
    logZ = jnp.log(jnp.sum(jnp.exp(logits - m), axis=-1, keepdims=True)) + m
    ll = logits - logZ
    gold_n = gold_BL.reshape(-1)
    mask_n = gold_mask_BL.reshape(-1, 1).astype(jnp.float32)
    ll_m = ll * mask_n
    non_pad = gold_n != PAD
    nll_rows = -ll_m[jnp.arange(gold_n.shape[0]), gold_n]
    nll = jnp.sum(jnp.where(non_pad, nll_rows, 0.0))
    smooth_rows = -jnp.sum(ll_m, axis=-1)
    smooth = jnp.sum(jnp.where(non_pad, smooth_rows, 0.0))
    eps_i = label_smoothing / V
    loss = (1.0 - label_smoothing) * nll + eps_i * smooth
    abs_logZ = jnp.sum(jnp.abs(logZ[:, 0] * mask_n[:, 0]))
    ok = jnp.sum((jnp.argmax(logits, axis=-1) == gold_n) & non_pad)
    return loss, nll, ok, abs_logZ


if __name__ == "__main__":
    # Small shapes chosen to exercise: multiple row tiles with row padding
    # (N=40 -> 48 at tn=16, so 3 partial-output tiles get summed), two vocab
    # tiles (V=250 at tile_v=128), and the padded-vocab path (250 % 128 != 0).
    B, L, H, V = 2, 20, 32, 250
    label_smoothing = 0.1

    key = jax.random.PRNGKey(0)
    k_feed, k_w, k_b, k_gold = jax.random.split(key, 4)

    feed_BLO = jax.random.normal(k_feed, (B, L, H), dtype=jnp.float32)
    # Classifier.__init__: normal weights with std = input_size ** -0.5; keep the
    # classifier weight stored in bf16 (review item: avoid a per-call f32->bf16 cast).
    weight_VH = (jax.random.normal(k_w, (V, H), dtype=jnp.float32)
                 * (H ** -0.5)).astype(jnp.bfloat16)
    bias_V = jax.random.normal(k_b, (V,), dtype=jnp.float32) * 0.01

    gold_BL = jax.random.randint(k_gold, (B, L), 1, V, dtype=jnp.int32)
    gold_BL = gold_BL.at[:, -2:].set(PAD)                 # some padding positions
    gold_mask_BL = (gold_BL != PAD).astype(jnp.float32)

    out = classifier_forward(feed_BLO, gold_BL, gold_mask_BL, weight_VH, bias_V,
                             label_smoothing=label_smoothing,
                             tile_n=16, tile_v=128)
    loss, ce_loss, emb_loss, bow_loss, ok_ytoks, abs_logZ = out
    jax.block_until_ready((loss, ce_loss, ok_ytoks, abs_logZ))

    ref_loss, ref_nll, ref_ok, ref_absZ = reference_forward(
        feed_BLO, gold_BL, gold_mask_BL, weight_VH, bias_V, label_smoothing)

    assert jnp.allclose(loss, ref_loss, rtol=1e-4, atol=1e-3), (loss, ref_loss)
    assert jnp.allclose(ce_loss, ref_nll, rtol=1e-4, atol=1e-3), (ce_loss, ref_nll)
    assert jnp.allclose(abs_logZ, ref_absZ, rtol=1e-4, atol=1e-3), (abs_logZ, ref_absZ)
    assert int(ok_ytoks) == int(ref_ok), (ok_ytoks, ref_ok)

    print("KERNEL_OK")
</pallas_src>

<mosaic_0001>
module attributes {stable_mosaic.version = 11 : i64} {
  func.func @classifier_kernel(%arg0: i32, %arg1: i32, %arg2: memref<16x32xbf16, #tpu.memory_space<vmem>>, %arg3: memref<128x32xbf16, #tpu.memory_space<vmem>>, %arg4: memref<1x128xf32, #tpu.memory_space<vmem>>, %arg5: memref<16x1xi32, #tpu.memory_space<vmem>>, %arg6: memref<16x1xf32, #tpu.memory_space<vmem>>, %arg7: memref<1x8x128xf32, #tpu.memory_space<vmem>>, %arg8: memref<16x1xf32, #tpu.memory_space<vmem>>, %arg9: memref<16x1xf32, #tpu.memory_space<vmem>>, %arg10: memref<16x1xf32, #tpu.memory_space<vmem>>, %arg11: memref<16x1xf32, #tpu.memory_space<vmem>>) attributes {dimension_semantics = [#tpu.dimension_semantics<parallel>, #tpu.dimension_semantics<arbitrary>], iteration_bounds = array<i64: 3, 2>, scalar_prefetch = 0 : i64, scratch_operands = 4 : i64, tpu.core_type = #tpu.core_type<tc>, window_params = [{transform_indices = @transform_0, window_bounds = array<i64: 16, 32>}, {transform_indices = @transform_1, window_bounds = array<i64: 128, 32>}, {transform_indices = @transform_2, window_bounds = array<i64: 1, 128>}, {transform_indices = @transform_3, window_bounds = array<i64: 16, 1>}, {transform_indices = @transform_4, window_bounds = array<i64: 16, 1>}, {transform_indices = @transform_5, window_bounds = array<i64: 1, 8, 128>}]} {
    %c0_i32 = arith.constant 0 : i32
    %0 = arith.cmpi eq, %arg1, %c0_i32 : i32
    %1 = arith.extui %0 : i1 to i32
    %c0_i32_0 = arith.constant 0 : i32
    %2 = arith.cmpi ne, %1, %c0_i32_0 : i32
    scf.if %2 {
      %cst_32 = arith.constant 0xFF800000 : f32
      %51 = vector.broadcast %cst_32 : f32 to vector<16x1xf32>
      %c0_33 = arith.constant 0 : index
      %c0_34 = arith.constant 0 : index
      %52 = vector.load %arg8[%c0_33, %c0_34] : memref<16x1xf32, #tpu.memory_space<vmem>>, vector<16x1xf32>
      tpu.vector_store %arg8[%c0_33, %c0_34], %51 {strides = array<i32>} : memref<16x1xf32, #tpu.memory_space<vmem>>, vector<16x1xf32>,
      %cst_35 = arith.constant 0.000000e+00 : f32
      %53 = vector.broadcast %cst_35 : f32 to vector<16x1xf32>
      %c0_36 = arith.constant 0 : index
      %c0_37 = arith.constant 0 : index
      %54 = vector.load %arg9[%c0_36, %c0_37] : memref<16x1xf32, #tpu.memory_space<vmem>>, vector<16x1xf32>
      tpu.vector_store %arg9[%c0_36, %c0_37], %53 {strides = array<i32>} : memref<16x1xf32, #tpu.memory_space<vmem>>, vector<16x1xf32>,
      %cst_38 = arith.constant 0.000000e+00 : f32
      %55 = vector.broadcast %cst_38 : f32 to vector<16x1xf32>
      %c0_39 = arith.constant 0 : index
      %c0_40 = arith.constant 0 : index
      %56 = vector.load %arg10[%c0_39, %c0_40] : memref<16x1xf32, #tpu.memory_space<vmem>>, vector<16x1xf32>
      tpu.vector_store %arg10[%c0_39, %c0_40], %55 {strides = array<i32>} : memref<16x1xf32, #tpu.memory_space<vmem>>, vector<16x1xf32>,
      %cst_41 = arith.constant 0.000000e+00 : f32
      %57 = vector.broadcast %cst_41 : f32 to vector<16x1xf32>
      %c0_42 = arith.constant 0 : index
      %c0_43 = arith.constant 0 : index
      %58 = vector.load %arg11[%c0_42, %c0_43] : memref<16x1xf32, #tpu.memory_space<vmem>>, vector<16x1xf32>
      tpu.vector_store %arg11[%c0_42, %c0_43], %57 {strides = array<i32>} : memref<16x1xf32, #tpu.memory_space<vmem>>, vector<16x1xf32>,
    } else {
    }
    %c0 = arith.constant 0 : index
    %c0_1 = arith.constant 0 : index
    %3 = vector.load %arg2[%c0, %c0_1] : memref<16x32xbf16, #tpu.memory_space<vmem>>, vector<16x32xbf16>
    %c0_2 = arith.constant 0 : index
    %c0_3 = arith.constant 0 : index
    %4 = vector.load %arg3[%c0_2, %c0_3] : memref<128x32xbf16, #tpu.memory_space<vmem>>, vector<128x32xbf16>
    %cst = arith.constant dense<0.000000e+00> : vector<16x128xf32>
    %5 = tpu.matmul %3, %4, %cst {dimension_numbers = #tpu.dot_dimension_numbers<[1], [1], [0], [0], [0, 0, 1, 0], [], []>} : vector<16x32xbf16>, vector<128x32xbf16>, vector<16x128xf32> -> vector<16x128xf32>
    %c0_4 = arith.constant 0 : index
    %c0_5 = arith.constant 0 : index
    %6 = vector.load %arg4[%c0_4, %c0_5] : memref<1x128xf32, #tpu.memory_space<vmem>>, vector<1x128xf32>
    %7 = vector.broadcast %6 : vector<1x128xf32> to vector<16x128xf32>
    %8 = arith.addf %5, %7 : vector<16x128xf32>
    %c0_6 = arith.constant 0 : index
    %c0_7 = arith.constant 0 : index
    %9 = vector.load %arg5[%c0_6, %c0_7] : memref<16x1xi32, #tpu.memory_space<vmem>>, vector<16x1xi32>
    %c128_i32 = arith.constant 128 : i32
    %10 = arith.muli %arg1, %c128_i32 : i32
    %11 = tpu.iota {dimensions = array<i32: 1>} : vector<16x128xi32>
    %12 = vector.broadcast %10 : i32 to vector<16x128xi32>
    %13 = arith.addi %12, %11 : vector<16x128xi32>
    %cst_8 = arith.constant dense<0xFF800000> : vector<16xf32>
    %14 = vector.multi_reduction <maximumf>, %8, %cst_8 [1] : vector<16x128xf32> to vector<16xf32>
    %15 = vector.shape_cast %14 : vector<16xf32> to vector<16x1xf32>
    %c0_9 = arith.constant 0 : index
    %c0_10 = arith.constant 0 : index
    %16 = vector.load %arg8[%c0_9, %c0_10] : memref<16x1xf32, #tpu.memory_space<vmem>>, vector<16x1xf32>
    %17 = arith.maximumf %16, %15 : vector<16x1xf32>
    %c0_11 = arith.constant 0 : index
    %c0_12 = arith.constant 0 : index
    %18 = vector.load %arg9[%c0_11, %c0_12] : memref<16x1xf32, #tpu.memory_space<vmem>>, vector<16x1xf32>
    %19 = arith.subf %16, %17 : vector<16x1xf32>
    %20 = math.exp %19 : vector<16x1xf32>
    %21 = arith.mulf %18, %20 : vector<16x1xf32>
    %22 = vector.broadcast %17 : vector<16x1xf32> to vector<16x128xf32>
    %23 = arith.subf %8, %22 : vector<16x128xf32>
    %24 = math.exp %23 : vector<16x128xf32>
    %cst_13 = arith.constant dense<0.000000e+00> : vector<16xf32>
    %25 = vector.multi_reduction <add>, %24, %cst_13 [1] : vector<16x128xf32> to vector<16xf32>
    %26 = vector.shape_cast %25 : vector<16xf32> to vector<16x1xf32>
    %27 = arith.addf %21, %26 : vector<16x1xf32>
    %c0_14 = arith.constant 0 : index
    %c0_15 = arith.constant 0 : index
    %28 = vector.load %arg9[%c0_14, %c0_15] : memref<16x1xf32, #tpu.memory_space<vmem>>, vector<16x1xf32>
    tpu.vector_store %arg9[%c0_14, %c0_15], %27 {strides = array<i32>} : memref<16x1xf32, #tpu.memory_space<vmem>>, vector<16x1xf32>,
    %c0_16 = arith.constant 0 : index
    %c0_17 = arith.constant 0 : index
    %29 = vector.load %arg8[%c0_16, %c0_17] : memref<16x1xf32, #tpu.memory_space<vmem>>, vector<16x1xf32>
    tpu.vector_store %arg8[%c0_16, %c0_17], %17 {strides = array<i32>} : memref<16x1xf32, #tpu.memory_space<vmem>>, vector<16x1xf32>,
    %c0_18 = arith.constant 0 : index
    %c0_19 = arith.constant 0 : index
    %30 = vector.load %arg10[%c0_18, %c0_19] : memref<16x1xf32, #tpu.memory_space<vmem>>, vector<16x1xf32>
    %31 = vector.broadcast %9 : vector<16x1xi32> to vector<16x128xi32>
    %32 = arith.cmpi eq, %13, %31 : vector<16x128xi32>
    %cst_20 = arith.constant 0.000000e+00 : f32
    %33 = vector.broadcast %cst_20 : f32 to vector<16x128xf32>
    %34 = arith.select %32, %8, %33 : vector<16x128xi1>, vector<16x128xf32>
    %cst_21 = arith.constant dense<0.000000e+00> : vector<16xf32>
    %35 = vector.multi_reduction <add>, %34, %cst_21 [1] : vector<16x128xf32> to vector<16xf32>
    %36 = vector.shape_cast %35 : vector<16xf32> to vector<16x1xf32>
    %37 = arith.addf %30, %36 : vector<16x1xf32>
    %c0_22 = arith.constant 0 : index
    %c0_23 = arith.constant 0 : index
    %38 = vector.load %arg10[%c0_22, %c0_23] : memref<16x1xf32, #tpu.memory_space<vmem>>, vector<16x1xf32>
    tpu.vector_store %arg10[%c0_22, %c0_23], %37 {strides = array<i32>} : memref<16x1xf32, #tpu.memory_space<vmem>>, vector<16x1xf32>,
    %cst_24 = arith.constant -1.000000e+29 : f32
    %39 = vector.broadcast %cst_24 : f32 to vector<16x128xf32>
    %40 = arith.cmpf ogt, %8, %39 : vector<16x128xf32>
    %cst_25 = arith.constant 0.000000e+00 : f32
    %41 = vector.broadcast %cst_25 : f32 to vector<16x128xf32>
    %42 = arith.select %40, %8, %41 : vector<16x128xi1>, vector<16x128xf32>
    %c0_26 = arith.constant 0 : index
    %c0_27 = arith.constant 0 : index
    %43 = vector.load %arg11[%c0_26, %c0_27] : memref<16x1xf32, #tpu.memory_space<vmem>>, vector<16x1xf32>
    %cst_28 = arith.constant dense<0.000000e+00> : vector<16xf32>
    %44 = vector.multi_reduction <add>, %42, %cst_28 [1] : vector<16x128xf32> to vector<16xf32>
    %45 = vector.shape_cast %44 : vector<16xf32> to vector<16x1xf32>
    %46 = arith.addf %43, %45 : vector<16x1xf32>
    %c0_29 = arith.constant 0 : index
    %c0_30 = arith.constant 0 : index
    %47 = vector.load %arg11[%c0_29, %c0_30] : memref<16x1xf32, #tpu.memory_space<vmem>>, vector<16x1xf32>
    tpu.vector_store %arg11[%c0_29, %c0_30], %46 {strides = array<i32>} : memref<16x1xf32, #tpu.memory_space<vmem>>, vector<16x1xf32>,
    %c1_i32 = arith.constant 1 : i32
    %48 = arith.cmpi eq, %arg1, %c1_i32 : i32
    %49 = arith.extui %48 : i1 to i32
    %c0_i32_31 = arith.constant 0 : i32
    %50 = arith.cmpi ne, %49, %c0_i32_31 : i32
    scf.if %50 {
      %c0_32 = arith.constant 0 : index
      %c0_33 = arith.constant 0 : index
      %51 = vector.load %arg6[%c0_32, %c0_33] : memref<16x1xf32, #tpu.memory_space<vmem>>, vector<16x1xf32>
      %c0_34 = arith.constant 0 : index
      %c0_35 = arith.constant 0 : index
      %52 = vector.load %arg9[%c0_34, %c0_35] : memref<16x1xf32, #tpu.memory_space<vmem>>, vector<16x1xf32>
      %53 = math.log %52 : vector<16x1xf32>
      %c0_36 = arith.constant 0 : index
      %c0_37 = arith.constant 0 : index
      %54 = vector.load %arg8[%c0_36, %c0_37] : memref<16x1xf32, #tpu.memory_space<vmem>>, vector<16x1xf32>
      %55 = arith.addf %53, %54 : vector<16x1xf32>
      %c0_i32_38 = arith.constant 0 : i32
      %56 = vector.broadcast %c0_i32_38 : i32 to vector<16x1xi32>
      %57 = arith.cmpi ne, %9, %56 : vector<16x1xi32>
      %58 = arith.extui %57 : vector<16x1xi1> to vector<16x1xi32>
      %59 = arith.sitofp %58 : vector<16x1xi32> to vector<16x1xf32>
      %60 = arith.mulf %51, %59 : vector<16x1xf32>
      %c0_39 = arith.constant 0 : index
      %c0_40 = arith.constant 0 : index
      %61 = vector.load %arg10[%c0_39, %c0_40] : memref<16x1xf32, #tpu.memory_space<vmem>>, vector<16x1xf32>
      %62 = arith.subf %55, %61 : vector<16x1xf32>
      %63 = arith.mulf %62, %60 : vector<16x1xf32>
      %64 = vector.shape_cast %63 : vector<16x1xf32> to vector<1x16x1xf32>
      %cst_41 = arith.constant dense<0.000000e+00> : vector<1xf32>
      %65 = vector.multi_reduction <add>, %64, %cst_41 [1, 2] : vector<1x16x1xf32> to vector<1xf32>
      %66 = vector.shape_cast %65 : vector<1xf32> to vector<1x1x1xf32>
      %67 = vector.extract %66[0, 0, 0] : f32 from vector<1x1x1xf32>
      %cst_42 = arith.constant 2.500000e+02 : f32
      %68 = vector.broadcast %cst_42 : f32 to vector<16x1xf32>
      %69 = arith.mulf %68, %55 : vector<16x1xf32>
      %c0_43 = arith.constant 0 : index
      %c0_44 = arith.constant 0 : index
      %70 = vector.load %arg11[%c0_43, %c0_44] : memref<16x1xf32, #tpu.memory_space<vmem>>, vector<16x1xf32>
      %71 = arith.subf %69, %70 : vector<16x1xf32>
      %72 = arith.mulf %71, %60 : vector<16x1xf32>
      %73 = vector.shape_cast %72 : vector<16x1xf32> to vector<1x16x1xf32>
      %cst_45 = arith.constant dense<0.000000e+00> : vector<1xf32>
      %74 = vector.multi_reduction <add>, %73, %cst_45 [1, 2] : vector<1x16x1xf32> to vector<1xf32>
      %75 = vector.shape_cast %74 : vector<1xf32> to vector<1x1x1xf32>
      %76 = vector.extract %75[0, 0, 0] : f32 from vector<1x1x1xf32>
      %77 = math.absf %55 : vector<16x1xf32>
      %78 = arith.mulf %77, %51 : vector<16x1xf32>
      %79 = vector.shape_cast %78 : vector<16x1xf32> to vector<1x16x1xf32>
      %cst_46 = arith.constant dense<0.000000e+00> : vector<1xf32>
      %80 = vector.multi_reduction <add>, %79, %cst_46 [1, 2] : vector<1x16x1xf32> to vector<1xf32>
      %81 = vector.shape_cast %80 : vector<1xf32> to vector<1x1x1xf32>
      %82 = vector.extract %81[0, 0, 0] : f32 from vector<1x1x1xf32>
      %c0_47 = arith.constant 0 : index
      %c0_48 = arith.constant 0 : index
      %83 = vector.load %arg10[%c0_47, %c0_48] : memref<16x1xf32, #tpu.memory_space<vmem>>, vector<16x1xf32>
      %c0_49 = arith.constant 0 : index
      %c0_50 = arith.constant 0 : index
      %84 = vector.load %arg8[%c0_49, %c0_50] : memref<16x1xf32, #tpu.memory_space<vmem>>, vector<16x1xf32>
      %85 = arith.cmpf oeq, %83, %84 : vector<16x1xf32>
      %c0_i32_51 = arith.constant 0 : i32
      %86 = vector.broadcast %c0_i32_51 : i32 to vector<16x1xi32>
      %87 = arith.cmpi ne, %9, %86 : vector<16x1xi32>
      %88 = arith.andi %85, %87 : vector<16x1xi1>
      %cst_52 = arith.constant 1.000000e+00 : f32
      %cst_53 = arith.constant 0.000000e+00 : f32
      %89 = vector.broadcast %cst_52 : f32 to vector<16x1xf32>
      %90 = vector.broadcast %cst_53 : f32 to vector<16x1xf32>
      %91 = arith.select %88, %89, %90 : vector<16x1xi1>, vector<16x1xf32>
      %92 = vector.shape_cast %91 : vector<16x1xf32> to vector<1x16x1xf32>
      %cst_54 = arith.constant dense<0.000000e+00> : vector<1xf32>
      %93 = vector.multi_reduction <add>, %92, %cst_54 [1, 2] : vector<1x16x1xf32> to vector<1xf32>
      %94 = vector.shape_cast %93 : vector<1xf32> to vector<1x1x1xf32>
      %95 = vector.extract %94[0, 0, 0] : f32 from vector<1x1x1xf32>
      %96 = tpu.iota {dimensions = array<i32: 0>} : vector<8x128xi32>
      %c0_i32_55 = arith.constant 0 : i32
      %97 = vector.broadcast %c0_i32_55 : i32 to vector<8x128xi32>
      %98 = arith.cmpi eq, %96, %97 : vector<8x128xi32>
      %c1_i32_56 = arith.constant 1 : i32
      %99 = vector.broadcast %c1_i32_56 : i32 to vector<8x128xi32>
      %100 = arith.cmpi eq, %96, %99 : vector<8x128xi32>
      %c2_i32 = arith.constant 2 : i32
      %101 = vector.broadcast %c2_i32 : i32 to vector<8x128xi32>
      %102 = arith.cmpi eq, %96, %101 : vector<8x128xi32>
      %c3_i32 = arith.constant 3 : i32
      %103 = vector.broadcast %c3_i32 : i32 to vector<8x128xi32>
      %104 = arith.cmpi eq, %96, %103 : vector<8x128xi32>
      %cst_57 = arith.constant 0.000000e+00 : f32
      %105 = vector.broadcast %95 : f32 to vector<8x128xf32>
      %106 = vector.broadcast %cst_57 : f32 to vector<8x128xf32>
      %107 = arith.select %104, %105, %106 : vector<8x128xi1>, vector<8x128xf32>
      %108 = vector.broadcast %82 : f32 to vector<8x128xf32>
      %109 = arith.select %102, %108, %107 : vector<8x128xi1>, vector<8x128xf32>
      %110 = vector.broadcast %76 : f32 to vector<8x128xf32>
      %111 = arith.select %100, %110, %109 : vector<8x128xi1>, vector<8x128xf32>
      %112 = vector.broadcast %67 : f32 to vector<8x128xf32>
      %113 = arith.select %98, %112, %111 : vector<8x128xi1>, vector<8x128xf32>
      %c0_58 = arith.constant 0 : index
      %c0_59 = arith.constant 0 : index
      %c0_60 = arith.constant 0 : index
      %114 = vector.load %arg7[%c0_58, %c0_59, %c0_60] : memref<1x8x128xf32, #tpu.memory_space<vmem>>, vector<1x8x128xf32>
      %115 = vector.shape_cast %114 : vector<1x8x128xf32> to vector<8x128xf32>
      %116 = vector.shape_cast %113 : vector<8x128xf32> to vector<1x8x128xf32>
      tpu.vector_store %arg7[%c0_58, %c0_59, %c0_60], %116 {strides = array<i32>} : memref<1x8x128xf32, #tpu.memory_space<vmem>>, vector<1x8x128xf32>,
    } else {
    }
    return
  }
  func.func @transform_0(%arg0: i32, %arg1: i32) -> (i32, i32) {
    %c0_i32 = arith.constant 0 : i32
    %c0_i32_0 = arith.constant 0 : i32
    return %arg0, %c0_i32 : i32, i32
  }
  func.func @transform_1(%arg0: i32, %arg1: i32) -> (i32, i32) {
    %c0_i32 = arith.constant 0 : i32
    %c0_i32_0 = arith.constant 0 : i32
    return %arg1, %c0_i32 : i32, i32
  }
  func.func @transform_2(%arg0: i32, %arg1: i32) -> (i32, i32) {
    %c0_i32 = arith.constant 0 : i32
    %c0_i32_0 = arith.constant 0 : i32
    return %c0_i32, %arg1 : i32, i32
  }
  func.func @transform_3(%arg0: i32, %arg1: i32) -> (i32, i32) {
    %c0_i32 = arith.constant 0 : i32
    %c0_i32_0 = arith.constant 0 : i32
    return %arg0, %c0_i32 : i32, i32
  }
  func.func @transform_4(%arg0: i32, %arg1: i32) -> (i32, i32) {
    %c0_i32 = arith.constant 0 : i32
    %c0_i32_0 = arith.constant 0 : i32
    return %arg0, %c0_i32 : i32, i32
  }
  func.func @transform_5(%arg0: i32, %arg1: i32) -> (i32, i32, i32) {
    %c0_i32 = arith.constant 0 : i32
    %c0_i32_0 = arith.constant 0 : i32
    %c0_i32_1 = arith.constant 0 : i32
    return %arg0, %c0_i32, %c0_i32_0 : i32, i32, i32
  }
}

</mosaic_0001>

<bundles_post_ra>
// kernel: classifier_forward.1
= control target key start
LH: loop header
LB: loop body
LE: loop exit
PB: predicated region body
PF: predicated region fallthrough
CT: control target
= control target key end

     0   :  { %s954_s18 = smov 0   ;;  %s956_s19 = smov 0   ;;  %s1105_s0 = inlined_call_operand.vmem [shape: bf16[48,32], index: 0, kind: input, shape index: {}]   ;;  %s1106_s1 = inlined_call_operand.vmem [shape: bf16[256,32], index: 1, kind: input, shape index: {}]   ;;  %s1107_s2 = inlined_call_operand.vmem [shape: f32[1,256], index: 2, kind: input, shape index: {}]   ;;  %s1108_s3 = inlined_call_operand.vmem [shape: s32[48,1], index: 3, kind: input, shape index: {}]   ;;  %s1109_s4 = inlined_call_operand.vmem [shape: f32[48,1], index: 4, kind: input, shape index: {}]   ;;  %s1110_s5 = inlined_call_operand.vmem [shape: f32[3,8,128], index: 5, kind: output, shape index: {}]  }
   0x1   :  { %s958_s20 = smov 0   ;;  %s960_s21 = smov 0  }
   0x2   :  { %s962_s22 = smov 0  }
   0x3 LB: > { %s24_s23 = sadd.s32 1, %s910_s20  ;;  %s27_s24 = sadd.s32 1, %s914_s21  ;;  %s918_s22 = sphi %s962_s22, %s15_s22   ;;  %s914_s21 = sphi %s960_s21, %s1114_s21   ;;  %s910_s20 = sphi %s958_s20, %s1113_s20   ;;  %s906_s19 = sphi %s956_s19, %s1112_s19   ;;  %s902_s18 = sphi %s954_s18, %s1111_s18  }
   0x4   : > { %p25_p0 = scmp.ge.s32.totalorder %s24_s23, 2  ;;  %p749_p1 = scmp.ge.s32.totalorder %s918_s22, 1 }
   0x5   : > { %p241_p2 = scmp.lt.s32.totalorder %s918_s22, 7 }
   0x6   : > { %s1116_s23 = smov (%p25_p0, %s24_s23), 0  ;;  %s1118_s24 = smov (!%p25_p0, %s27_s24), %s914_s21 }
   0x7   : > { %p242_p3 = pnand %p749_p1, %p241_p2  ;;  %p29_p4 = scmp.ge.s32.totalorder %s1118_s24, 3 }
   0x8   : > { %s750_s25 = sshll.u32 (!%p242_p3), %s906_s19, 1  ;;  %s752_s26 = sshll.u32 (!%p242_p3), %s902_s18, 4 }
   0x9   : > { %s1120_s24 = smov (%p29_p4, %s1118_s24), 0  ;;  %245 = sbr.rel (%p242_p3) target bundleno = 829 (0x33d), region = 40 }
   0xa   : > { %p287_p5 = scmp.lt.s32.totalorder (!%p242_p3), %s750_s25, 5  ;;  %p293_p6 = scmp.lt.s32.totalorder (!%p242_p3), %s752_s26, 31 }
   0xb   : > { %p298_p7 = scmp.lt.s32.totalorder (!%p242_p3), %s902_s18, 1  ;;  %p313_p8 = scmp.lt.s32.totalorder (!%p242_p3), %s906_s19, 2 }
   0xc   : > { %p759_p9 = scmp.ne.s32.totalorder (!%p242_p3), %s902_s18, 0 }
   0xe   : > { %s1122_s25 = smov (!%p287_p5, %s750_s25), 5  ;;  %s1124_s26 = smov (!%p293_p6, %s752_s26), 31 }
   0xf   : > { %s751_s27 = sshll.u32 %s1122_s25, 2  ;;  %s755_s28 = sshll.u32 %s1122_s25, 3 }
  0x10   : > { %s995_s6 = scalar_lea.vmem %s1105_s0, %s751_s27  ;;  %s753_s7 = sshll.u32 %s1124_s26, 2 }
  0x11   : > { %s1000_s10 = scalar_lea.vmem %s1106_s1, %s753_s7  ;;  %s1005_s13 = scalar_lea.vmem %s1108_s3, %s755_s28 }
  0x12   : > { %s1008_s14 = scalar_select %p298_p7, %s902_s18, 1 }
  0x13   : > { %s1013_s17 = scalar_lea.vmem %s1109_s4, %s755_s28  ;;  %s1126_s19 = smov (!%p313_p8, %s906_s19), 2 }
  0x14   : > { %s300_s27 = scalar_lea.vmem %s1107_s2, %s1008_s14  ;;  %s758_s29 = sshll.u32 %s1126_s19, 3 }
  0x15   : > { %s1023_s8 = scalar_lea.vmem %s1110_s5, %s758_s29  ;;  %320 = sbr.rel (%p759_p9) target bundleno = 35 (0x23), region = 44 }
  0x1a   : > { %vm321_vm0 = vcmask 7168   ;;  %v920_v0 = vmov -inf   ;;  %v921_v1 = vmov 0.0  }
  0x1b   : > { %322 = vst.msk [vmem:[#allocation2] sm:$0xff] %vm321_vm0, %v920_v0 }
  0x1c   : > { %323 = vst.msk [vmem:[#allocation2 + $0x8] sm:$0xff] %vm321_vm0, %v920_v0 }
  0x1d   : > { %324 = vst.msk [vmem:[#allocation3] sm:$0xff] %vm321_vm0, %v921_v1 }
  0x1e   : > { %325 = vst.msk [vmem:[#allocation3 + $0x8] sm:$0xff] %vm321_vm0, %v921_v1 }
  0x1f   : > { %326 = vst.msk [vmem:[#allocation4] sm:$0xff] %vm321_vm0, %v921_v1 }
  0x20   : > { %327 = vst.msk [vmem:[#allocation4 + $0x8] sm:$0xff] %vm321_vm0, %v921_v1 }
  0x21   : > { %328 = vst.msk [vmem:[#allocation5] sm:$0xff] %vm321_vm0, %v921_v1 }
  0x22   : > { %329 = vst.msk [vmem:[#allocation5 + $0x8] sm:$0xff] %vm321_vm0, %v921_v1 }
  0x23 PF: > { %v811_v2 = vld [vmem:[%s1000_s10 + $0x38] sm:$0xff]  ;;  %vm397_vm1 = vcmask 261120   ;;  %v810_v4 = vld [vmem:[%s1000_s10 + $0x30] sm:$0xff]  ;;  %v809_v6 = vld [vmem:[%s1000_s10 + $0x28] sm:$0xff]  ;;  %v922_v13 = vmov 0   ;;  %v442_v22 = vlaneseq  ;;  %s797_s19 = sshll.u32 %s902_s18, 7 }
  0x24   : > { %v423_v3 = vsel %vm397_vm1, %v811_v2, 0  ;;  %v420_v5 = vsel %vm397_vm1, %v810_v4, 0  ;;  %v417_v7 = vsel %vm397_vm1, %v809_v6, 0  ;;  %v808_v8 = vld [vmem:[%s1000_s10 + $0x20] sm:$0xff]  ;;  %v807_v10 = vld [vmem:[%s1000_s10 + $0x18] sm:$0xff]  ;;  %865 = vset.pattern.permute.xlu2 %v922_v13  ;;  %v806_v14 = vld [vmem:[%s1000_s10 + $0x10] sm:$0xff]  ;;  %864 = vset.pattern.permute.xlu1 %v922_v13  ;;  %v444_v24 = vstv %s797_s19 }
  0x25   : > { %425 = vmatpush.bf16.xpose.msra.mxu0 %v423_v3  ;;  %v414_v9 = vsel %vm397_vm1, %v808_v8, 0  ;;  %v411_v11 = vsel %vm397_vm1, %v807_v10, 0  ;;  %v1037_v12 = vld [vmem:[%s1005_s13] sm:$0xff]  ;;  %866 = vset.pattern.permute.xlu0 %v922_v13  ;;  %v408_v15 = vsel %vm397_vm1, %v806_v14, 0  ;;  %v1043_v16 = vld [vmem:[%s1005_s13 + $0x8] sm:$0xff]  ;;  %v443_v23 = vand.u32 127, %v442_v22 }
  0x26   : > { %494 = vperm.xlu2 %865, %v1037_v12   ;;  %v805_v17 = vld [vmem:[%s1000_s10 + $0x8] sm:$0xff]  ;;  %v804_v19 = vld [vmem:[%s1000_s10] sm:$0xff]  ;;  %vm486_vm3 = vcmask 7168   ;;  %v454_v59 = vld [vmem:[#allocation3] sm:$0xff]  ;;  %p798_p10 = scmp.ne.s32.totalorder %s902_s18, 1 }
  0x27   : > { %v405_v18 = vsel %vm397_vm1, %v805_v17, 0  ;;  %v402_v20 = vsel %vm397_vm1, %v804_v19, 0  ;;  %v803_v21 = vld [vmem:[%s995_s6] sm:$0xff]  ;;  %v445_v25 = vadd.s32 %v444_v24, %v443_v23  ;;  %v451_v41 = vld [vmem:[#allocation2 + $0x8] sm:$0xff]  ;;  %v455_v0 = vld [vmem:[#allocation3 + $0x8] sm:$0xff] }
  0x28   : > { %v867_v26 = vld [vmem:[%s300_s27] ss:$0 sm:$0xff]  ;;  %v492_v1 = vld [vmem:[#allocation4 + $0x8] sm:$0xff] }
  0x29   : > { %v450_v34 = vld [vmem:[#allocation2] sm:$0xff]  ;;  %v516_v10 = vld [vmem:[#allocation5 + $0x8] sm:$0xff] }
  0x2a   : > { %v491_v35 = vld [vmem:[#allocation4] sm:$0xff] }
  0x2d   : > { %426 = vmatpush.bf16.xpose.msra.mxu0 %v420_v5 }
  0x2e   : > { %497 = vperm.xlu2 %865, %v1043_v16  }
  0x35   : > { %427 = vmatpush.bf16.xpose.msra.mxu0 %v417_v7  ;;  %v515_v7 = vld [vmem:[#allocation5] sm:$0xff] }
  0x3d   : > { %428 = vmatpush.bf16.xpose.msra.mxu0 %v414_v9 }
  0x45   : > { %429 = vmatpush.bf16.xpose.msra.mxu0 %v411_v11 }
  0x4d   : > { %430 = vmatpush.bf16.xpose.msra.mxu0 %v408_v15 }
  0x55   : > { %431 = vmatpush.bf16.xpose.msra.mxu0 %v405_v18 }
  0x5d   : > { %432 = vmatpush.bf16.xpose.msra.mxu0 %v402_v20 }
  0x64   : > { %796 = vmatmul.msk.bf16.vlgmr.msra.gmra.mxu0 %vm397_vm1, %v803_v21 }
  0x80   : > { %v495_v27 = vpop.permute.xlu2 %494 }
  0x81   : > { %vm499_vm2 = vcmp.eq.s32.totalorder %v445_v25, %v495_v27 }
  0x88   : > { %v498_v33 = vpop.permute.xlu2 %497 }
  0x89   : > { %vm500_vm4 = vcmp.eq.s32.totalorder %v445_v25, %v498_v33 }
  0xe1   : > { %v434_v28 = vpop.f32.mrf.mxu0 }
  0xe2   : > { %v435_v29 = vadd.f32 %v867_v26, %v434_v28 }
  0xe4   : > { %446 = vmax.xlane.f32.xlu0 %v435_v29  ;;  %v501_v30 = vsel %vm499_vm2, %v435_v29, 0.0  ;;  %vm511_vm5 = vcmp.gt.f32.partialorder %v435_v29, -1e+29 }
  0xe5   : > { %503 = vadd.xlane.f32.xlu2 %v501_v30  ;;  %v513_v54 = vsel %vm511_vm5, %v435_v29, 0.0 }
  0xe9   : > { %v436_v31 = vpop.f32.mrf.mxu0 }
  0xea   : > { %v437_v32 = vadd.f32 %v867_v26, %v436_v31 }
  0xec   : > { %448 = vmax.xlane.f32.xlu0 %v437_v32  ;;  %v502_v53 = vsel %vm500_vm4, %v437_v32, 0.0  ;;  %vm512_vm6 = vcmp.gt.f32.partialorder %v437_v32, -1e+29 }
  0xed   : > { %v514_v55 = vsel %vm512_vm6, %v437_v32, 0.0 }
 0x157   : > { %v447_v36 = vpop.xlane.xlu0 %446 }
 0x158   : > { %v452_v37 = vmax.f32 %v450_v34, %v447_v36  ;;  %v504_v38 = vpop.xlane.xlu2 %503 }
 0x159   : > { %v507_v39 = vadd.f32 %v504_v38, %v491_v35 }
 0x15a   : > { %v456_v40 = vsub.f32 %v450_v34, %v452_v37  ;;  %489 = vst.msk [vmem:[#allocation2] sm:$0xff] %vm486_vm3, %v452_v37  ;;  %466 = vperm.xlu1 %864, %v452_v37  }
 0x15b   : > { %509 = vst.msk [vmem:[#allocation4] sm:$0xff] %vm486_vm3, %v507_v39 }
 0x15c   : > { %v458_v56 = vmul.f32 1.442695, %v456_v40 }
 0x15f   : > { %v449_v42 = vpop.xlane.xlu0 %448 }
 0x160   : > { %v453_v43 = vmax.f32 %v451_v41, %v449_v42 }
 0x162   : > { %v457_v44 = vsub.f32 %v451_v41, %v453_v43  ;;  %490 = vst.msk [vmem:[#allocation2 + $0x8] sm:$0xff] %vm486_vm3, %v453_v43  ;;  %471 = vperm.xlu1 %864, %v453_v43  }
 0x164   : > { %v460_v57 = vmul.f32 1.442695, %v457_v44 }
 0x1cc   : > { %v467_v45 = vpop.permute.xlu1 %466 }
 0x1cd   : > { %v474_v46 = vsub.f32 %v435_v29, %v467_v45 }
 0x1cf   : > { %v476_v47 = vmul.f32 1.442695, %v474_v46 }
 0x1d1   : > { %868 = vpow2.f32 %v476_v47 }
 0x1d4   : > { %v472_v48 = vpop.permute.xlu1 %471 }
 0x1d5   : > { %v475_v49 = vsub.f32 %v437_v32, %v472_v48 }
 0x1d7   : > { %v869_v50 = vpop.eup %868  ;;  %v478_v51 = vmul.f32 1.442695, %v475_v49 }
 0x1d8   : > { %480 = vadd.xlane.f32.xlu0 %v869_v50 }
 0x1d9   : > { %870 = vpow2.f32 %v478_v51 }
 0x1da   : > { %872 = vpow2.f32 %v458_v56 }
 0x1db   : > { %874 = vpow2.f32 %v460_v57 }
 0x1df   : > { %v871_v52 = vpop.eup %870 }
 0x1e0   : > { %505 = vadd.xlane.f32.xlu0 %v502_v53  ;;  %482 = vadd.xlane.f32.xlu1 %v871_v52  ;;  %v873_v58 = vpop.eup %872 }
 0x1e1   : > { %v462_v60 = vmul.f32 %v873_v58, %v454_v59  ;;  %v875_v63 = vpop.eup %874 }
 0x1e2   : > { %v463_v2 = vmul.f32 %v875_v63, %v455_v0 }
 0x1e8   : > { %517 = vadd.xlane.f32.xlu0 %v513_v54 }
 0x1f0   : > { %519 = vadd.xlane.f32.xlu0 %v514_v55 }
 0x24b   : > { %v481_v61 = vpop.xlane.xlu0 %480 }
 0x24c   : > { %v484_v62 = vadd.f32 %v481_v61, %v462_v60 }
 0x24e   : > { %487 = vst.msk [vmem:[#allocation3] sm:$0xff] %vm486_vm3, %v484_v62 }
 0x253   : > { %v483_v3 = vpop.xlane.xlu1 %482  ;;  %v506_v4 = vpop.xlane.xlu0 %505 }
 0x254   : > { %v485_v5 = vadd.f32 %v483_v3, %v463_v2  ;;  %v508_v6 = vadd.f32 %v506_v4, %v492_v1 }
 0x256   : > { %488 = vst.msk [vmem:[#allocation3 + $0x8] sm:$0xff] %vm486_vm3, %v485_v5 }
 0x257   : > { %510 = vst.msk [vmem:[#allocation4 + $0x8] sm:$0xff] %vm486_vm3, %v508_v6 }
 0x25b   : > { %v518_v8 = vpop.xlane.xlu0 %517 }
 0x25c   : > { %v521_v9 = vadd.f32 %v518_v8, %v515_v7 }
 0x25e   : > { %523 = vst.msk [vmem:[#allocation5] sm:$0xff] %vm486_vm3, %v521_v9 }
 0x262   : > { %528 = sbr.rel (%p798_p10) target bundleno = 829 (0x33d), region = 48 }
 0x263   : > { %v520_v11 = vpop.xlane.xlu0 %519 }
 0x264   : > { %v522_v13 = vadd.f32 %v520_v11, %v516_v10 }
 0x266   : > { %524 = vst.msk [vmem:[#allocation5 + $0x8] sm:$0xff] %vm486_vm3, %v522_v13 }
 0x267   : > { %v531_v14 = vld [vmem:[#allocation3] sm:$0xff]  ;;  %v532_v15 = vld [vmem:[#allocation3 + $0x8] sm:$0xff]  ;;  %vm541_vm7 = vcmp.ne.s32.totalorder %v1037_v12, 0  ;;  %vm542_vm8 = vcmp.ne.s32.totalorder %v1043_v16, 0  ;;  %v529_v18 = vld [vmem:[%s1013_s17] sm:$0xff]  ;;  %v923_v20 = vmov 0.0  }
 0x268   : > { %876 = vlog2.f32 %v531_v14  ;;  %v537_v19 = vld [vmem:[#allocation2] sm:$0xff]  ;;  %v799_v21 = vsel %vm541_vm7, 1.0, %v923_v20  ;;  %v530_v24 = vld [vmem:[%s1013_s17 + $0x8] sm:$0xff]  ;;  %v800_v27 = vsel %vm542_vm8, 1.0, %v923_v20  ;;  %v569_v35 = vld [vmem:[#allocation5] sm:$0xff] }
 0x269   : > { %878 = vlog2.f32 %v532_v15  ;;  %v538_v26 = vld [vmem:[#allocation2 + $0x8] sm:$0xff]  ;;  %v549_v29 = vld [vmem:[#allocation4] sm:$0xff]  ;;  %v547_v31 = vmul.f32 %v799_v21, %v529_v18  ;;  %v548_v34 = vmul.f32 %v800_v27, %v530_v24 }
 0x26a   : > { %v550_v32 = vld [vmem:[#allocation4 + $0x8] sm:$0xff]  ;;  %vm603_vm9 = vcmp.eq.f32.partialorder %v549_v29, %v537_v19 }
 0x26b   : > { %vm604_vm10 = vcmp.eq.f32.partialorder %v550_v32, %v538_v26  ;;  %vm605_vm11 = vmand %vm603_vm9, %vm541_vm7 }
 0x26c   : > { %vm606_vm12 = vmand %vm604_vm10, %vm542_vm8  ;;  %v607_v56 = vsel %vm605_vm11, 1.0, %v923_v20 }
 0x26d   : > { %v570_v39 = vld [vmem:[#allocation5 + $0x8] sm:$0xff]  ;;  %v608_v57 = vsel %vm606_vm12, 1.0, %v923_v20  ;;  %v609_v16 = vsel %vm486_vm3, %v607_v56, 0.0 }
 0x26e   : > { %v877_v17 = vpop.eup %876  ;;  %v610_v58 = vsel %vm486_vm3, %v608_v57, 0.0 }
 0x26f   : > { %v879_v23 = vpop.eup %878  ;;  %v534_v25 = vmul.f32 0.6931472, %v877_v17  ;;  %v611_v61 = vadd.f32 %v610_v58, %v609_v16 }
 0x270   : > { %v536_v28 = vmul.f32 0.6931472, %v879_v23 }
 0x271   : > { %v539_v30 = vadd.f32 %v537_v19, %v534_v25 }
 0x272   : > { %v540_v33 = vadd.f32 %v538_v26, %v536_v28 }
 0x273   : > { %v587_v36 = vand.u32 2147483647, %v539_v30  ;;  %v551_v37 = vsub.f32 %v539_v30, %v549_v29  ;;  %v567_v38 = vmul.f32 250.0, %v539_v30  ;;  %v622_v30 = vshrl.u32 %v442_v22, 7 }
 0x274   : > { %v588_v40 = vand.u32 2147483647, %v540_v33  ;;  %v552_v41 = vsub.f32 %v540_v33, %v550_v32  ;;  %v568_v42 = vmul.f32 250.0, %v540_v33 }
 0x275   : > { %v589_v43 = vmul.f32 %v587_v36, %v529_v18  ;;  %v553_v44 = vmul.f32 %v551_v37, %v547_v31  ;;  %v571_v45 = vsub.f32 %v567_v38, %v569_v35  ;;  %vm626_vm13 = vcmp.eq.s32.totalorder %v622_v30, 3 }
 0x276   : > { %v590_v46 = vmul.f32 %v588_v40, %v530_v24  ;;  %v554_v47 = vmul.f32 %v552_v41, %v548_v34  ;;  %v572_v48 = vsub.f32 %v568_v42, %v570_v39  ;;  %vm625_vm14 = vcmp.eq.s32.totalorder %v622_v30, 2 }
 0x277   : > { %v591_v49 = vsel %vm486_vm3, %v589_v43, 0.0  ;;  %v555_v50 = vsel %vm486_vm3, %v553_v44, 0.0  ;;  %v573_v53 = vmul.f32 %v571_v45, %v547_v31  ;;  %vm624_vm15 = vcmp.eq.s32.totalorder %v622_v30, 1 }
 0x278   : > { %v592_v51 = vsel %vm486_vm3, %v590_v46, 0.0  ;;  %v556_v52 = vsel %vm486_vm3, %v554_v47, 0.0  ;;  %v574_v54 = vmul.f32 %v572_v48, %v548_v34  ;;  %vm623_vm0 = vcmp.eq.s32.totalorder %v622_v30, 0 }
 0x279   : > { %v593_v55 = vadd.f32 %v592_v51, %v591_v49  ;;  %v557_v12 = vadd.f32 %v556_v52, %v555_v50  ;;  %v575_v59 = vsel %vm486_vm3, %v573_v53, 0.0 }
 0x27a   : > { %v576_v60 = vsel %vm486_vm3, %v574_v54, 0.0 }
 0x27b   : > { %594 = vadd.xlane.f32.xlu1 %v593_v55  ;;  %558 = vadd.xlane.f32.xlu0 %v557_v12  ;;  %v577_v62 = vadd.f32 %v576_v60, %v575_v59 }
 0x283   : > { %612 = vadd.xlane.f32.xlu1 %v611_v61  ;;  %578 = vadd.xlane.f32.xlu0 %v577_v62 }
 0x2ee   : > { %v595_v63 = vpop.xlane.xlu1 %594  ;;  %v559_v0 = vpop.xlane.xlu0 %558 }
 0x2ef   : > { %v596_v1 = vrot.slane %v595_v63, 4  ;;  %v560_v2 = vrot.slane %v559_v0, 4 }
 0x2f1   : > { %v561_v3 = vadd.f32 %v560_v2, %v559_v0  ;;  %v597_v4 = vadd.f32 %v596_v1, %v595_v63 }
 0x2f3   : > { %v562_v5 = vrot.slane %v561_v3, 2  ;;  %v598_v7 = vrot.slane %v597_v4, 2 }
 0x2f5   : > { %v563_v6 = vadd.f32 %v562_v5, %v561_v3  ;;  %v599_v18 = vadd.f32 %v598_v7, %v597_v4 }
 0x2f6   : > { %v613_v8 = vpop.xlane.xlu1 %612  ;;  %v579_v9 = vpop.xlane.xlu0 %578 }
 0x2f7   : > { %v614_v10 = vrot.slane %v613_v8, 4  ;;  %v580_v11 = vrot.slane %v579_v9, 4  ;;  %v564_v13 = vrot.slane %v563_v6, 1  ;;  %v600_v24 = vrot.slane %v599_v18, 1 }
 0x2f9   : > { %v615_v14 = vadd.f32 %v614_v10, %v613_v8  ;;  %v581_v15 = vadd.f32 %v580_v11, %v579_v9  ;;  %v565_v17 = vadd.f32 %v564_v13, %v563_v6  ;;  %v601_v29 = vadd.f32 %v600_v24, %v599_v18 }
 0x2fb   : > { %v616_v19 = vrot.slane %v615_v14, 2  ;;  %v582_v20 = vrot.slane %v581_v15, 2  ;;  %812 = vpush %v565_v17 }
 0x2fd   : > { %v617_v21 = vadd.f32 %v616_v19, %v615_v14  ;;  %v583_v23 = vadd.f32 %v582_v20, %v581_v15 }
 0x2ff   : > { %v584_v25 = vrot.slane %v583_v23, 1  ;;  %v618_v26 = vrot.slane %v617_v21, 1 }
 0x301   : > { %v585_v27 = vadd.f32 %v584_v25, %v583_v23  ;;  %v619_v28 = vadd.f32 %v618_v26, %v617_v21 }
 0x303   : > { %814 = vpush %v585_v27 }
 0x304   : > { %816 = vpush %v601_v29 }
 0x305   : > { %818 = vpush %v619_v28 }
 0x32c   : > { %s813_s18 = spop %812 }
 0x32d   : > { %v633_v36 = vstv %s813_s18 }
 0x334   : > { %s815_s6 = spop %814 }
 0x335   : > { %s817_s10 = spop %816  ;;  %v631_v34 = vstv %s815_s6 }
 0x336   : > { %v629_v31 = vstv %s817_s10  ;;  %s819_s11 = spop %818 }
 0x337   : > { %v627_v32 = vstv %s819_s11 }
 0x338   : > { %v628_v33 = vsel %vm626_vm13, %v627_v32, 0.0 }
 0x339   : > { %v630_v35 = vsel %vm625_vm14, %v629_v31, %v628_v33 }
 0x33a   : > { %v632_v37 = vsel %vm624_vm15, %v631_v34, %v630_v35 }
 0x33b   : > { %v634_v38 = vsel %vm623_vm0, %v633_v36, %v632_v37 }
 0x33c   : > { %635 = vst [vmem:[%s1023_s8] sm:$0xff] %v634_v38 }
 0x33d PF: > { %s15_s22 = sadd.s32 1, %s918_s22   ;;  %s1111_s18 = smov %s910_s20 }
 0x33e   : > { %p12_p11 = scmp.ge.s32.totalorder %s15_s22, 8   ;;  %s1112_s19 = smov %s914_s21 }
 0x33f   : > { %s1113_s20 = smov %s1116_s23  ;;  %s1114_s21 = smov %s1120_s24 }
 0x340   :  { %14 = sbr.rel (!%p12_p11) target bundleno = 3 (0x3), region = 90 }

</bundles_post_ra>
